<compile_context>
chip_gen: v7x
topology: tpu7x:2x2x1
jax: 0.10.0
libtpu: 0.0.40
codegen_flags: <defaults>
</compile_context>

<pallas_src>
import functools

import jax
import jax.numpy as jnp
from jax.experimental import pallas as pl
from jax.experimental.pallas import tpu as pltpu


def _round_up(x, m):
    return (x + m - 1) // m * m


def _nce_loss_kernel(pos_ref, neg_ref, out_ref, acc_ref, *, true_b, tb):
    """Accumulates sum(positive) - sum(logsumexp(neg)) over batch tiles."""
    i = pl.program_id(0)

    @pl.when(i == 0)
    def _():
        acc_ref[...] = jnp.zeros_like(acc_ref)

    neg = neg_ref[...].astype(jnp.float32)       # (TB, N)
    pos = pos_ref[0].astype(jnp.float32)         # (1, TB)  lane-dense

    # Numerically-stable log-sum-exp over the negatives (per row).
    m = jnp.max(neg, axis=1, keepdims=True)                    # (TB, 1)
    s = jnp.sum(jnp.exp(neg - m), axis=1, keepdims=True)       # (TB, 1)
    lse = m + jnp.log(s)                                       # (TB, 1)

    # Mask out rows that are batch padding (ragged last tile).
    base = i * tb
    row_ids = base + jax.lax.broadcasted_iota(jnp.int32, (tb, 1), 0)
    lane_ids = base + jax.lax.broadcasted_iota(jnp.int32, (1, tb), 1)

    lse_sum = jnp.sum(jnp.where(row_ids < true_b, lse, 0.0),
                      axis=0, keepdims=True)                   # (1, 1)
    pos_sum = jnp.sum(jnp.where(lane_ids < true_b, pos, 0.0),
                      axis=1, keepdims=True)                   # (1, 1)

    acc_ref[...] += pos_sum - lse_sum

    @pl.when(i == pl.num_programs(0) - 1)
    def _():
        # loss = -mean(positive - lse) over the TRUE batch size.
        out_ref[...] = -acc_ref[...] * (1.0 / true_b)


def nce_loss(positive, negative_1, negative_2=None, *, tb_target=512):
    """JAX/Pallas equivalent of test().forward(...)'s returned value.

    negative_2 is accepted for interface parity but (as in the original
    module's returned value) does not influence the result.
    """
    B = positive.shape[0]
    N = negative_1.shape[1]
    itemsize = jnp.dtype(negative_1.dtype).itemsize

    # Batch tile: multiple of 8, big enough to amortize per-step overhead,
    # and small enough that the double-buffered negative tile stays well
    # under the scoped-VMEM default on all chips (v5e/v6e/v7x).
    vmem_budget = 8 * 1024 * 1024                    # per double-buffered input
    max_tb = max(8, (vmem_budget // (2 * N * itemsize)) // 8 * 8)
    tb = int(min(_round_up(B, 8), tb_target, max_tb))
    num_tiles = -(-B // tb)                          # cdiv
    b_pad = num_tiles * tb

    pos_flat = positive.reshape(B)
    neg = negative_1
    if b_pad != B:
        # TODO(synk): padding copies the negatives once; for very ragged B a
        # BoundedSlice-based last tile would avoid this extra HBM pass.
        pos_flat = jnp.pad(pos_flat, (0, b_pad - B))
        neg = jnp.pad(neg, ((0, b_pad - B), (0, 0)))
    pos_lanes = pos_flat.reshape(num_tiles, 1, tb)   # lane-dense positives

    kernel = functools.partial(_nce_loss_kernel, true_b=B, tb=tb)

    out = pl.pallas_call(
        kernel,
        out_shape=jax.ShapeDtypeStruct((1, 1), jnp.float32),
        grid_spec=pltpu.PrefetchScalarGridSpec(
            num_scalar_prefetch=0,
            grid=(num_tiles,),
            in_specs=[
                pl.BlockSpec((1, 1, tb), lambda i: (i, 0, 0)),   # positives
                pl.BlockSpec((tb, N), lambda i: (i, 0)),          # negatives
            ],
            out_specs=pl.BlockSpec((1, 1), lambda i: (0, 0)),
            scratch_shapes=[pltpu.VMEM((1, 1), jnp.float32)],
        ),
        compiler_params=pltpu.CompilerParams(
            dimension_semantics=("arbitrary",)),
    )(pos_lanes, neg)

    return out[0, 0]


def _reference(positive, negative_1):
    m = jnp.max(negative_1.astype(jnp.float32), axis=1, keepdims=True)
    lse = m + jnp.log(jnp.sum(jnp.exp(negative_1.astype(jnp.float32) - m),
                              axis=1, keepdims=True))
    return -jnp.mean(positive.astype(jnp.float32) - lse)


if __name__ == "__main__":
    key = jax.random.PRNGKey(0)
    k1, k2, k3, k4, k5 = jax.random.split(key, 5)

    # Case 1: the module's nominal small shapes (single tile).
    B, N = 8, 128
    positive = jax.random.normal(k1, (B, 1), dtype=jnp.float32)
    negative_1 = jax.random.normal(k2, (B, N), dtype=jnp.float32)
    negative_2 = jax.random.normal(k3, (B, N), dtype=jnp.float32)  # unused

    loss = nce_loss(positive, negative_1, negative_2)
    jax.block_until_ready(loss)
    ref = _reference(positive, negative_1)
    assert jnp.allclose(loss, ref, rtol=1e-5, atol=1e-5), (loss, ref)

    # Case 2: ragged batch + forced small tile to exercise the multi-tile
    # accumulator path and the padded-row masking.
    B2, N2 = 20, 256
    positive2 = jax.random.normal(k4, (B2, 1), dtype=jnp.float32)
    negative_1b = jax.random.normal(k5, (B2, N2), dtype=jnp.float32)

    loss2 = nce_loss(positive2, negative_1b, tb_target=8)
    jax.block_until_ready(loss2)
    ref2 = _reference(positive2, negative_1b)
    assert jnp.allclose(loss2, ref2, rtol=1e-5, atol=1e-5), (loss2, ref2)

    # TODO(synk): the CE / NLL / no-overflow / denPos variants in forward()
    # are print-only side effects, not part of the returned value; omitted.
    print("KERNEL_OK")
</pallas_src>

<mosaic_0001>
module attributes {stable_mosaic.version = 11 : i64} {
  func.func @_nce_loss_kernel(%arg0: i32, %arg1: memref<1x1x8xf32, #tpu.memory_space<vmem>>, %arg2: memref<8x128xf32, #tpu.memory_space<vmem>>, %arg3: memref<1x1xf32, #tpu.memory_space<vmem>>, %arg4: memref<1x1xf32, #tpu.memory_space<vmem>>) attributes {dimension_semantics = [#tpu.dimension_semantics<arbitrary>], iteration_bounds = array<i64: 1>, scalar_prefetch = 0 : i64, scratch_operands = 1 : i64, tpu.core_type = #tpu.core_type<tc>, window_params = [{transform_indices = @transform_0, window_bounds = array<i64: 1, 1, 8>}, {transform_indices = @transform_1, window_bounds = array<i64: 8, 128>}, {pipeline_mode = #tpu.pipeline_mode<synchronous>, transform_indices = @transform_2, window_bounds = array<i64: 1, 1>}]} {
    %c0_i32 = arith.constant 0 : i32
    %0 = arith.cmpi eq, %arg0, %c0_i32 : i32
    %1 = arith.extui %0 : i1 to i32
    %c0_i32_0 = arith.constant 0 : i32
    %2 = arith.cmpi ne, %1, %c0_i32_0 : i32
    scf.if %2 {
      %cst_18 = arith.constant 0.000000e+00 : f32
      %41 = vector.broadcast %cst_18 : f32 to vector<1x1xf32>
      %c0_19 = arith.constant 0 : index
      %c0_20 = arith.constant 0 : index
      %42 = vector.load %arg4[%c0_19, %c0_20] : memref<1x1xf32, #tpu.memory_space<vmem>>, vector<1x1xf32>
      tpu.vector_store %arg4[%c0_19, %c0_20], %41 {strides = array<i32>} : memref<1x1xf32, #tpu.memory_space<vmem>>, vector<1x1xf32>,
    } else {
    }
    %c0 = arith.constant 0 : index
    %c0_1 = arith.constant 0 : index
    %3 = vector.load %arg2[%c0, %c0_1] : memref<8x128xf32, #tpu.memory_space<vmem>>, vector<8x128xf32>
    %c0_2 = arith.constant 0 : index
    %c0_3 = arith.constant 0 : index
    %c0_4 = arith.constant 0 : index
    %4 = vector.load %arg1[%c0_2, %c0_3, %c0_4] : memref<1x1x8xf32, #tpu.memory_space<vmem>>, vector<1x1x8xf32>
    %5 = vector.shape_cast %4 : vector<1x1x8xf32> to vector<1x8xf32>
    %cst = arith.constant dense<0xFF800000> : vector<8xf32>
    %6 = vector.multi_reduction <maximumf>, %3, %cst [1] : vector<8x128xf32> to vector<8xf32>
    %7 = vector.shape_cast %6 : vector<8xf32> to vector<8x1xf32>
    %8 = vector.broadcast %7 : vector<8x1xf32> to vector<8x128xf32>
    %9 = arith.subf %3, %8 : vector<8x128xf32>
    %10 = math.exp %9 : vector<8x128xf32>
    %cst_5 = arith.constant dense<0.000000e+00> : vector<8xf32>
    %11 = vector.multi_reduction <add>, %10, %cst_5 [1] : vector<8x128xf32> to vector<8xf32>
    %12 = vector.shape_cast %11 : vector<8xf32> to vector<8x1xf32>
    %13 = math.log %12 : vector<8x1xf32>
    %14 = arith.addf %7, %13 : vector<8x1xf32>
    %c8_i32 = arith.constant 8 : i32
    %15 = arith.muli %arg0, %c8_i32 : i32
    %16 = tpu.iota {dimensions = array<i32: 0>} : vector<8x1xi32>
    %17 = vector.broadcast %15 : i32 to vector<8x1xi32>
    %18 = arith.addi %17, %16 : vector<8x1xi32>
    %19 = tpu.iota {dimensions = array<i32: 1>} : vector<1x8xi32>
    %20 = vector.broadcast %15 : i32 to vector<1x8xi32>
    %21 = arith.addi %20, %19 : vector<1x8xi32>
    %c8_i32_6 = arith.constant 8 : i32
    %22 = vector.broadcast %c8_i32_6 : i32 to vector<8x1xi32>
    %23 = arith.cmpi slt, %18, %22 : vector<8x1xi32>
    %cst_7 = arith.constant 0.000000e+00 : f32
    %24 = vector.broadcast %cst_7 : f32 to vector<8x1xf32>
    %25 = arith.select %23, %14, %24 : vector<8x1xi1>, vector<8x1xf32>
    %cst_8 = arith.constant dense<0.000000e+00> : vector<1xf32>
    %26 = vector.multi_reduction <add>, %25, %cst_8 [0] : vector<8x1xf32> to vector<1xf32>
    %27 = vector.shape_cast %26 : vector<1xf32> to vector<1x1xf32>
    %c8_i32_9 = arith.constant 8 : i32
    %28 = vector.broadcast %c8_i32_9 : i32 to vector<1x8xi32>
    %29 = arith.cmpi slt, %21, %28 : vector<1x8xi32>
    %cst_10 = arith.constant 0.000000e+00 : f32
    %30 = vector.broadcast %cst_10 : f32 to vector<1x8xf32>
    %31 = arith.select %29, %5, %30 : vector<1x8xi1>, vector<1x8xf32>
    %cst_11 = arith.constant dense<0.000000e+00> : vector<1xf32>
    %32 = vector.multi_reduction <add>, %31, %cst_11 [1] : vector<1x8xf32> to vector<1xf32>
    %33 = vector.shape_cast %32 : vector<1xf32> to vector<1x1xf32>
    %c0_12 = arith.constant 0 : index
    %c0_13 = arith.constant 0 : index
    %34 = vector.load %arg4[%c0_12, %c0_13] : memref<1x1xf32, #tpu.memory_space<vmem>>, vector<1x1xf32>
    %35 = arith.subf %33, %27 : vector<1x1xf32>
    %36 = arith.addf %34, %35 : vector<1x1xf32>
    %c0_14 = arith.constant 0 : index
    %c0_15 = arith.constant 0 : index
    %37 = vector.load %arg4[%c0_14, %c0_15] : memref<1x1xf32, #tpu.memory_space<vmem>>, vector<1x1xf32>
    tpu.vector_store %arg4[%c0_14, %c0_15], %36 {strides = array<i32>} : memref<1x1xf32, #tpu.memory_space<vmem>>, vector<1x1xf32>,
    %c0_i32_16 = arith.constant 0 : i32
    %38 = arith.cmpi eq, %arg0, %c0_i32_16 : i32
    %39 = arith.extui %38 : i1 to i32
    %c0_i32_17 = arith.constant 0 : i32
    %40 = arith.cmpi ne, %39, %c0_i32_17 : i32
    scf.if %40 {
      %c0_18 = arith.constant 0 : index
      %c0_19 = arith.constant 0 : index
      %41 = vector.load %arg4[%c0_18, %c0_19] : memref<1x1xf32, #tpu.memory_space<vmem>>, vector<1x1xf32>
      %cst_20 = arith.constant 0.000000e+00 : f32
      %42 = vector.broadcast %cst_20 : f32 to vector<1x1xf32>
      %43 = arith.subf %42, %41 : vector<1x1xf32>
      %cst_21 = arith.constant 1.250000e-01 : f32
      %44 = vector.broadcast %cst_21 : f32 to vector<1x1xf32>
      %45 = arith.mulf %43, %44 : vector<1x1xf32>
      %c0_22 = arith.constant 0 : index
      %c0_23 = arith.constant 0 : index
      %46 = vector.load %arg3[%c0_22, %c0_23] : memref<1x1xf32, #tpu.memory_space<vmem>>, vector<1x1xf32>
      tpu.vector_store %arg3[%c0_22, %c0_23], %45 {strides = array<i32>} : memref<1x1xf32, #tpu.memory_space<vmem>>, vector<1x1xf32>,
    } else {
    }
    return
  }
  func.func @transform_0(%arg0: i32) -> (i32, i32, i32) {
    %c0_i32 = arith.constant 0 : i32
    %c0_i32_0 = arith.constant 0 : i32
    %c0_i32_1 = arith.constant 0 : i32
    return %arg0, %c0_i32, %c0_i32_0 : i32, i32, i32
  }
  func.func @transform_1(%arg0: i32) -> (i32, i32) {
    %c0_i32 = arith.constant 0 : i32
    %c0_i32_0 = arith.constant 0 : i32
    return %arg0, %c0_i32 : i32, i32
  }
  func.func @transform_2(%arg0: i32) -> (i32, i32) {
    %c0_i32 = arith.constant 0 : i32
    %c0_i32_0 = arith.constant 0 : i32
    %c0_i32_1 = arith.constant 0 : i32
    return %c0_i32, %c0_i32_0 : i32, i32
  }
}

</mosaic_0001>

<bundles_post_ra>
// kernel: tpu_custom_call.1
= control target key start
LH: loop header
LB: loop body
LE: loop exit
PB: predicated region body
PF: predicated region fallthrough
CT: control target
= control target key end

     0   :  { %7 = vsyncpa [#allocation4], 0  ;;  %s242_s0 = inlined_call_operand.hbm [shape: f32[1,1,8], index: 0, kind: input, shape index: {}]   ;;  %s243_s1 = inlined_call_operand.hbm [shape: f32[8,128], index: 1, kind: input, shape index: {}]   ;;  %s244_s2 = inlined_call_operand.hbm [shape: f32[1,1], index: 2, kind: output, shape index: {}]  }
   0x1   :  { %8 = vsyncpa [#allocation7], 0 }
   0x2   :  { %9 = vsyncpa [#allocation5], 0  ;;  %s184_s9 = smov [#allocation3]   ;;  %s185_s11 = smov [#allocation6]  }
   0x3   :  { %s16_s10 = sshll.u32 %s184_s9, 4  ;;  %s26_s12 = sshll.u32 %s185_s11, 4  ;;  %s17_s10 = int_to_ptr.vmem [resolvable:$true] %s16_s10  ;;  %s27_s12 = int_to_ptr.vmem [resolvable:$true] %s26_s12 }
   0x4   :  { %s112_s15 = scalar_lea.hbm %s242_s0, 16 }
   0x5   :  { %p113_p0 = scmp.ne.s32.totalorder %s242_s0, %s112_s15  ;;  %p116_p1 = scmp.lt.u32.totalorder %s112_s15, %s242_s0 }
   0x7   :  { %p118_p2 = pnand %p116_p1, %p113_p0 }
   0x9   :  { %121 = shalt.err (!%p118_p2)
}
   0xa   :  { %s122_s20 = scalar_lea.vmem %s17_s10, 16  ;;  %s126_s21 = scalar_lea.vmem %s17_s10, 32 }
   0xb   :  { %p123_p3 = scmp.ne.s32.totalorder %s17_s10, %s122_s20  ;;  %p127_p4 = scmp.lt.s32.totalorder %s17_s10, %s17_s10 }
   0xc   :  { %p128_p5 = scmp.lt.s32.totalorder %s126_s21, %s122_s20 }
   0xe   :  { %p129_p6 = por %p128_p5, %p127_p4 }
  0x10   :  { %p130_p7 = pnand %p129_p6, %p123_p3 }
  0x12   :  { %133 = shalt.err (!%p130_p7)
}
  0x13   :  { %19 = dma.hbm_to_vmem [thread:$0]  %s242_s0, 16, %s17_s10, [#allocation4]  }
  0x14   :  { %s134_s26 = scalar_lea.hbm %s243_s1, 128 }
  0x15   :  { %p135_p8 = scmp.ne.s32.totalorder %s243_s1, %s134_s26  ;;  %p138_p9 = scmp.lt.u32.totalorder %s134_s26, %s243_s1 }
  0x17   :  { %p140_p10 = pnand %p138_p9, %p135_p8 }
  0x19   :  { %143 = shalt.err (!%p140_p10)
}
  0x1a   :  { %s144_s3 = scalar_lea.vmem %s27_s12, 128  ;;  %p149_p12 = scmp.lt.s32.totalorder %s27_s12, %s27_s12 }
  0x1b   :  { %p145_p11 = scmp.ne.s32.totalorder %s27_s12, %s144_s3  ;;  %p150_p13 = scmp.lt.s32.totalorder %s144_s3, %s144_s3 }
  0x1d   :  { %p151_p0 = por %p150_p13, %p149_p12 }
  0x1f   :  { %p152_p1 = pnand %p151_p0, %p145_p11 }
  0x21   :  { %155 = shalt.err (!%p152_p1)
}
  0x22   :  { %29 = dma.hbm_to_vmem [thread:$0]  %s243_s1, 128, %s27_s12, [#allocation7]  }
  0x23   :  { %178 = dma.done.wait [#allocation4], 16  }
  0x24   :  { %179 = vsyncadd [#allocation4], 4294967280 }
  0x25   :  { %180 = dma.done.wait [#allocation7], 128  }
  0x26   :  { %181 = vsyncadd [#allocation7], 4294967168  ;;  %v42_v0 = vld [vmem:[#allocation6] sm:$0xff]  ;;  %v59_v1 = vlaneseq  ;;  %v43_v2 = vld [vmem:[#allocation3] sm:$0x1]  ;;  %vm72_vm0 = vcmask 57344  }
  0x27   :  { %44 = vmax.xlane.f32.xlu0 %v42_v0  ;;  %vm40_vm2 = vcmask 0   ;;  %v186_v10 = vmov 0.0   ;;  %s187_s1 = smov [#allocation8]  }
  0x28   :  { %v60_v3 = vand.u32 127, %v59_v1  ;;  %41 = vst.msk [vmem:[#allocation2] sm:$0x1] %vm40_vm2, %v186_v10  ;;  %s94_s5 = sshll.u32 %s187_s1, 4  ;;  %s95_s5 = int_to_ptr.vmem [resolvable:$true] %s94_s5 }
  0x29   :  { %s156_s6 = scalar_lea.vmem %s95_s5, 16  ;;  %s160_s7 = scalar_lea.vmem %s95_s5, 32 }
  0x2a   :  { %vm70_vm1 = vcmp.lt.s32.totalorder %v60_v3, 8  ;;  %p157_p2 = scmp.ne.s32.totalorder %s95_s5, %s156_s6  ;;  %p161_p3 = scmp.lt.s32.totalorder %s95_s5, %s95_s5 }
  0x2b   :  { %v71_v4 = vsel %vm70_vm1, %v43_v2, 0.0  ;;  %p162_p4 = scmp.lt.s32.totalorder %s160_s7, %s156_s6 }
  0x2c   :  { %v73_v5 = vsel %vm72_vm0, %v71_v4, 0.0 }
  0x2d   :  { %74 = vadd.xlane.f32.xlu1 %v73_v5  ;;  %p163_p5 = por %p162_p4, %p161_p3 }
  0x2f   :  { %v76_v22 = vld [vmem:[#allocation2] sm:$0x1]  ;;  %p164_p6 = pnand %p163_p5, %p157_p2 }
  0xb4   :  { %v45_v6 = vpop.xlane.xlu0 %44 }
  0xb5   :  { %v46_v7 = vsub.f32 %v42_v0, %v45_v6 }
  0xb7   :  { %v47_v8 = vmul.f32 1.442695, %v46_v7 }
  0xb9   :  { %108 = vpow2.f32 %v47_v8 }
  0xba   :  { %v75_v20 = vpop.xlane.xlu1 %74 }
  0xc3   :  { %v109_v9 = vpop.eup %108 }
  0xc4   :  { %49 = vadd.xlane.f32.xlu0 %v109_v9 }
 0x151   :  { %v50_v11 = vpop.xlane.xlu0 %49 }
 0x152   :  { %110 = vlog2.f32 %v50_v11 }
 0x15c   :  { %v111_v12 = vpop.eup %110 }
 0x15d   :  { %v52_v13 = vmul.f32 0.6931472, %v111_v12 }
 0x15f   :  { %v53_v14 = vadd.f32 %v52_v13, %v45_v6 }
 0x161   :  { %v64_v15 = vrot.slane %v53_v14, 4 }
 0x163   :  { %v65_v16 = vadd.f32 %v64_v15, %v53_v14 }
 0x165   :  { %v66_v17 = vrot.slane %v65_v16, 2 }
 0x167   :  { %v67_v18 = vadd.f32 %v66_v17, %v65_v16 }
 0x169   :  { %v68_v19 = vrot.slane %v67_v18, 1 }
 0x16b   :  { %v69_v21 = vadd.f32 %v68_v19, %v67_v18 }
 0x16d   :  { %v77_v23 = vsub.f32 %v75_v20, %v69_v21 }
 0x16f   :  { %v78_v24 = vadd.f32 %v77_v23, %v76_v22 }
 0x171   :  { %80 = vst.msk [vmem:[#allocation2] sm:$0x1] %vm40_vm2, %v78_v24 }
 0x178   :  { %v84_v25 = vld [vmem:[#allocation2] sm:$0x1] }
 0x179   :  { %v85_v26 = vsub.f32 0.0, %v84_v25 }
 0x17b   :  { %v86_v27 = vmul.f32 0.125, %v85_v26 }
 0x17d   :  { %87 = vst.msk [vmem:[#allocation8] sm:$0x1] %vm40_vm2, %v86_v27 }
 0x17e   :  { %167 = shalt.err (!%p164_p6)
}
 0x17f   :  { %s168_s10 = scalar_lea.hbm %s244_s2, 16 }
 0x180   :  { %p169_p7 = scmp.ne.s32.totalorder %s244_s2, %s168_s10  ;;  %p172_p8 = scmp.lt.u32.totalorder %s168_s10, %s244_s2 }
 0x182   :  { %p174_p9 = pnand %p172_p8, %p169_p7 }
 0x184   :  { %177 = shalt.err (!%p174_p9)
}
 0x185   :  { %97 = dma.vmem_to_hbm [thread:$0]  %s95_s5, 16, %s244_s2, [#allocation5]  }
 0x186   :  { %182 = dma.done.wait [#allocation5], 16  }
 0x187   :  { %183 = vsyncadd [#allocation5], 4294967280 }
 0x188   :  { %101 = vsyncpa [#allocation4], 1 }
 0x189   :  { %102 = vsyncpa [#allocation7], 1 }
 0x18a   :  { %103 = vsyncpa [#allocation5], 1 }

</bundles_post_ra>
